<compile_context>
chip_gen: v7x
topology: tpu7x:2x2x1
jax: 0.10.0
libtpu: 0.0.40
codegen_flags: <defaults>
</compile_context>

<pallas_src>
import functools

import jax
import jax.numpy as jnp
import numpy as np
from jax.experimental import pallas as pl
from jax.experimental.pallas import tpu as pltpu


# ---------------------------------------------------------------------------
# helpers
# ---------------------------------------------------------------------------
def _ceil_to(x: int, m: int) -> int:
    return ((x + m - 1) // m) * m


def _pick_tile(padded_dim: int, preferred: int, min_blocks: int = 1) -> int:
    """Largest multiple-of-128 divisor of `padded_dim` that is <= `preferred`,
    preferring choices that leave at least `min_blocks` blocks."""
    cands = [t for t in range(128, min(preferred, padded_dim) + 1, 128)
             if padded_dim % t == 0]
    if not cands:
        cands = [padded_dim]
    for t in reversed(cands):
        if padded_dim // t >= min_blocks:
            return t
    return cands[0]


def _pad2d(x, rows, cols):
    r, c = x.shape
    if (r, c) == (rows, cols):
        return x
    return jnp.pad(x, ((0, rows - r), (0, cols - c)))


# ---------------------------------------------------------------------------
# dense tiled spmm (adj @ embeds), accumulating directly into the output block
# ---------------------------------------------------------------------------
def _spmm_dense_kernel(adj_ref, emb_ref, out_ref, *, tk, emb_resident):
    k = pl.program_id(2)

    @pl.when(k == 0)
    def _():
        out_ref[...] = jnp.zeros_like(out_ref)

    if emb_resident:
        # embeds is a full (Kp, tn) resident slab: slice out this k-chunk.
        start = pl.multiple_of(k * tk, 128)
        emb = emb_ref[pl.ds(start, tk), :]
    else:
        emb = emb_ref[...]

    out_ref[...] += jnp.dot(adj_ref[...], emb,
                            preferred_element_type=jnp.float32)


def gcn_layer(adj, embeds, *, tm=None, tn=None, tk=None, use_bf16=False,
              emb_resident_budget_bytes=8 * 1024 * 1024):
    """Pallas TPU implementation of GCNLayer.forward: spmm(adj, embeds)."""
    N, K = adj.shape
    K2, D = embeds.shape
    assert K == K2, "adj columns must match embeds rows"

    Np, Kp, Dp = _ceil_to(N, 128), _ceil_to(K, 128), _ceil_to(D, 128)
    tm = tm or _pick_tile(Np, 512, min_blocks=2)   # keep >=2 row blocks (megacore)
    tk = tk or _pick_tile(Kp, 512)
    tn = tn or _pick_tile(Dp, 512)

    in_dtype = jnp.bfloat16 if use_bf16 else jnp.float32
    adj_p = _pad2d(adj, Np, Kp).astype(in_dtype)
    emb_p = _pad2d(embeds, Kp, Dp).astype(in_dtype)
    isz = jnp.dtype(in_dtype).itemsize

    # Keep the (small) embeds operand fully VMEM-resident across the k sweep
    # when it fits the budget; adj is then streamed from HBM exactly once.
    emb_resident = 2 * Kp * tn * isz <= emb_resident_budget_bytes
    if emb_resident:
        emb_spec = pl.BlockSpec((Kp, tn), lambda i, j, k: (0, j))
    else:
        emb_spec = pl.BlockSpec((tk, tn), lambda i, j, k: (k, j))

    cost = pl.CostEstimate(
        flops=2 * Np * Kp * Dp,
        transcendentals=0,
        bytes_accessed=Np * Kp * isz + Kp * Dp * isz + Np * Dp * 4,
    )

    out_p = pl.pallas_call(
        functools.partial(_spmm_dense_kernel, tk=tk, emb_resident=emb_resident),
        out_shape=jax.ShapeDtypeStruct((Np, Dp), jnp.float32),
        grid_spec=pltpu.PrefetchScalarGridSpec(
            num_scalar_prefetch=0,
            grid=(Np // tm, Dp // tn, Kp // tk),
            in_specs=[
                pl.BlockSpec((tm, tk), lambda i, j, k: (i, k)),
                emb_spec,
            ],
            out_specs=pl.BlockSpec((tm, tn), lambda i, j, k: (i, j)),
        ),
        compiler_params=pltpu.CompilerParams(
            dimension_semantics=("parallel", "parallel", "arbitrary"),
            vmem_limit_bytes=32 * 1024 * 1024,
        ),
        cost_estimate=cost,
    )(adj_p, emb_p)

    return out_p[:N, :D]


# ---------------------------------------------------------------------------
# block-sparse spmm: skip empty (tm x tk) adjacency blocks via scalar prefetch
# ---------------------------------------------------------------------------
def _spmm_block_sparse_kernel(rows_ref, cols_ref, valid_ref, first_ref,
                              adj_ref, emb_ref, out_ref):
    b = pl.program_id(1)

    @pl.when(first_ref[b] == 1)          # first block of this output row-tile
    def _():
        out_ref[...] = jnp.zeros_like(out_ref)

    @pl.when(valid_ref[b] == 1)          # dummy entries (empty rows) skip the dot
    def _():
        out_ref[...] += jnp.dot(adj_ref[...], emb_ref[...],
                                preferred_element_type=jnp.float32)


def gcn_layer_block_sparse(adj, embeds, *, tm=None, tn=None, tk=None,
                           use_bf16=False):
    """spmm(adj, embeds) streaming only non-empty adjacency blocks.
    The block schedule is built host-side from the concrete adjacency, so this
    path needs a concrete (non-traced) `adj`."""
    N, K = adj.shape
    K2, D = embeds.shape
    assert K == K2, "adj columns must match embeds rows"

    Np, Kp, Dp = _ceil_to(N, 128), _ceil_to(K, 128), _ceil_to(D, 128)
    tm = tm or _pick_tile(Np, 256, min_blocks=2)
    tk = tk or _pick_tile(Kp, 256)
    tn = tn or _pick_tile(Dp, 512)
    ni, nk, nj = Np // tm, Kp // tk, Dp // tn

    adj_p = _pad2d(adj, Np, Kp)
    emb_p = _pad2d(embeds, Kp, Dp)

    # Host-side CSR-of-blocks schedule: (row, col) of every non-empty block,
    # row-major; `first` marks the start of a row's run (zero the output tile);
    # `valid`==0 marks the dummy entry emitted for an all-empty row so its
    # output tile is still written (as zeros).
    blk_mask = (np.asarray(adj_p).reshape(ni, tm, nk, tk) != 0).any(axis=(1, 3))
    rows, cols, valid, first = [], [], [], []
    for i in range(ni):
        ks = np.nonzero(blk_mask[i])[0]
        if ks.size == 0:
            rows.append(i); cols.append(0); valid.append(0); first.append(1)
        else:
            for n_idx, kblk in enumerate(ks):
                rows.append(i); cols.append(int(kblk)); valid.append(1)
                first.append(1 if n_idx == 0 else 0)
    nb = len(rows)

    rows_a = jnp.asarray(rows, jnp.int32)
    cols_a = jnp.asarray(cols, jnp.int32)
    valid_a = jnp.asarray(valid, jnp.int32)
    first_a = jnp.asarray(first, jnp.int32)

    in_dtype = jnp.bfloat16 if use_bf16 else jnp.float32
    adj_p = adj_p.astype(in_dtype)
    emb_p = emb_p.astype(in_dtype)
    isz = jnp.dtype(in_dtype).itemsize

    cost = pl.CostEstimate(
        flops=2 * nb * tm * tk * Dp,
        transcendentals=0,
        bytes_accessed=nb * tm * tk * isz + Kp * Dp * isz + Np * Dp * 4,
    )

    out_p = pl.pallas_call(
        _spmm_block_sparse_kernel,
        out_shape=jax.ShapeDtypeStruct((Np, Dp), jnp.float32),
        grid_spec=pltpu.PrefetchScalarGridSpec(
            num_scalar_prefetch=4,
            grid=(nj, nb),
            in_specs=[
                pl.BlockSpec((tm, tk),
                             lambda j, b, r, c, v, f: (r[b], c[b])),
                pl.BlockSpec((tk, tn),
                             lambda j, b, r, c, v, f: (c[b], j)),
            ],
            out_specs=pl.BlockSpec((tm, tn),
                                   lambda j, b, r, c, v, f: (r[b], j)),
        ),
        compiler_params=pltpu.CompilerParams(
            dimension_semantics=("parallel", "arbitrary"),
            vmem_limit_bytes=32 * 1024 * 1024,
        ),
        cost_estimate=cost,
    )(rows_a, cols_a, valid_a, first_a, adj_p, emb_p)

    return out_p[:N, :D]


# ---------------------------------------------------------------------------
if __name__ == "__main__":
    key = jax.random.PRNGKey(0)
    k_adj, k_mask, k_emb = jax.random.split(key, 3)

    # Small HCCF/GCN-style problem: non-multiple-of-128 feature dim (exercises
    # padding), a banded ~sparse adjacency stored densely (zeros where there is
    # no edge -> identical semantics to t.spmm), and a block of isolated nodes
    # (rows 512..639 all-zero) to exercise the empty-row path.
    N, D = 640, 96
    vals = jax.random.uniform(k_adj, (N, N), dtype=jnp.float32)
    idx = jnp.arange(N)
    band = jnp.abs(idx[:, None] - idx[None, :]) <= 96
    rand = jax.random.uniform(k_mask, (N, N)) < 0.10
    mask = (band & rand).astype(jnp.float32) * (idx[:, None] < 512)
    adj = vals * mask
    embeds = jax.random.normal(k_emb, (N, D), dtype=jnp.float32)

    ref = adj @ embeds

    # 1) dense tiled path (f32 inputs, f32 accumulation)
    out = jax.block_until_ready(gcn_layer(adj, embeds))
    assert out.shape == (N, D)
    assert jnp.allclose(out, ref, atol=1e-4, rtol=1e-4)

    # 2) block-sparse path (only non-empty adjacency blocks are streamed)
    out_bs = jax.block_until_ready(gcn_layer_block_sparse(adj, embeds))
    assert out_bs.shape == (N, D)
    assert jnp.allclose(out_bs, ref, atol=1e-4, rtol=1e-4)

    # gcn_layer(adj, embeds, use_bf16=True) is available to halve adj HBM
    # traffic (f32 accumulation); not exercised here to keep runtime short.

    print("KERNEL_OK")
</pallas_src>

<mosaic_0001>
module attributes {stable_mosaic.version = 11 : i64} {
  func.func @_spmm_dense_kernel(%arg0: i32, %arg1: i32, %arg2: i32, %arg3: memref<128x128xf32, #tpu.memory_space<vmem>>, %arg4: memref<640x128xf32, #tpu.memory_space<vmem>>, %arg5: memref<128x128xf32, #tpu.memory_space<vmem>>) attributes {dimension_semantics = [#tpu.dimension_semantics<parallel>, #tpu.dimension_semantics<parallel>, #tpu.dimension_semantics<arbitrary>], iteration_bounds = array<i64: 5, 1, 5>, scalar_prefetch = 0 : i64, scratch_operands = 0 : i64, tpu.core_type = #tpu.core_type<tc>, window_params = [{transform_indices = @transform_0, window_bounds = array<i64: 128, 128>}, {transform_indices = @transform_1, window_bounds = array<i64: 640, 128>}, {transform_indices = @transform_2, window_bounds = array<i64: 128, 128>}]} {
    %c0_i32 = arith.constant 0 : i32
    %0 = arith.cmpi eq, %arg2, %c0_i32 : i32
    %1 = arith.extui %0 : i1 to i32
    %c0_i32_0 = arith.constant 0 : i32
    %2 = arith.cmpi ne, %1, %c0_i32_0 : i32
    scf.if %2 {
      %cst_7 = arith.constant 0.000000e+00 : f32
      %12 = vector.broadcast %cst_7 : f32 to vector<128x128xf32>
      %c0_8 = arith.constant 0 : index
      %c0_9 = arith.constant 0 : index
      %13 = vector.load %arg5[%c0_8, %c0_9] : memref<128x128xf32, #tpu.memory_space<vmem>>, vector<128x128xf32>
      tpu.vector_store %arg5[%c0_8, %c0_9], %12 {strides = array<i32>} : memref<128x128xf32, #tpu.memory_space<vmem>>, vector<128x128xf32>,
    } else {
    }
    %c128_i32 = arith.constant 128 : i32
    %3 = arith.muli %arg2, %c128_i32 : i32
    %4 = tpu.assume_multiple %3, 128 : i32
    %5 = arith.index_cast %4 : i32 to index
    %c0 = arith.constant 0 : index
    %6 = vector.load %arg4[%5, %c0] : memref<640x128xf32, #tpu.memory_space<vmem>>, vector<128x128xf32>
    %c0_1 = arith.constant 0 : index
    %c0_2 = arith.constant 0 : index
    %7 = vector.load %arg5[%c0_1, %c0_2] : memref<128x128xf32, #tpu.memory_space<vmem>>, vector<128x128xf32>
    %c0_3 = arith.constant 0 : index
    %c0_4 = arith.constant 0 : index
    %8 = vector.load %arg3[%c0_3, %c0_4] : memref<128x128xf32, #tpu.memory_space<vmem>>, vector<128x128xf32>
    %cst = arith.constant dense<0.000000e+00> : vector<128x128xf32>
    %9 = tpu.matmul %8, %6, %cst {dimension_numbers = #tpu.dot_dimension_numbers<[1], [0], [0], [1], [0, 0, 1, 1], [], []>} : vector<128x128xf32>, vector<128x128xf32>, vector<128x128xf32> -> vector<128x128xf32>
    %10 = arith.addf %7, %9 : vector<128x128xf32>
    %c0_5 = arith.constant 0 : index
    %c0_6 = arith.constant 0 : index
    %11 = vector.load %arg5[%c0_5, %c0_6] : memref<128x128xf32, #tpu.memory_space<vmem>>, vector<128x128xf32>
    tpu.vector_store %arg5[%c0_5, %c0_6], %10 {strides = array<i32>} : memref<128x128xf32, #tpu.memory_space<vmem>>, vector<128x128xf32>,
    return
  }
  func.func @transform_0(%arg0: i32, %arg1: i32, %arg2: i32) -> (i32, i32) {
    %c0_i32 = arith.constant 0 : i32
    return %arg0, %arg2 : i32, i32
  }
  func.func @transform_1(%arg0: i32, %arg1: i32, %arg2: i32) -> (i32, i32) {
    %c0_i32 = arith.constant 0 : i32
    %c0_i32_0 = arith.constant 0 : i32
    return %c0_i32, %arg1 : i32, i32
  }
  func.func @transform_2(%arg0: i32, %arg1: i32, %arg2: i32) -> (i32, i32) {
    %c0_i32 = arith.constant 0 : i32
    return %arg0, %arg1 : i32, i32
  }
}

</mosaic_0001>

<bundles_post_ra>
// kernel: tpu_custom_call.1
= control target key start
LH: loop header
LB: loop body
LE: loop exit
PB: predicated region body
PF: predicated region fallthrough
CT: control target
= control target key end

     0   :  { %s1427_s0 = inlined_call_operand.hbm [shape: f32[640,640], index: 0, kind: input, shape index: {}]   ;;  %s1428_s1 = inlined_call_operand.hbm [shape: f32[640,128], index: 1, kind: input, shape index: {}]   ;;  %s1429_s2 = inlined_call_operand.hbm [shape: f32[640,128], index: 2, kind: output, shape index: {}]  }
   0x1   :  { %1442 = sst [smem:[#allocation15_spill]] %s1428_s1 }
   0x2   :  { %7 = vsyncpa [#allocation3], 0 }
   0x3   :  { %9 = vsyncpa [#allocation3 + $0x1], 0 }
   0x4   :  { %10 = vsyncpa [#allocation6], 0 }
   0x5   :  { %11 = vsyncpa [#allocation4], 0 }
   0x6   :  { %13 = vsyncpa [#allocation4 + $0x1], 0  ;;  %s1065_s9 = smov 0   ;;  %s1067_s10 = smov 0  }
   0x7   :  { %s1069_s11 = smov 0   ;;  %s1071_s12 = smov 0  }
   0x8   :  { %s1073_s13 = smov 0   ;;  %s1075_s14 = smov 0  }
   0x9   :  { %s1077_s15 = smov 0   ;;  %s1079_s16 = smov 0  }
   0xa   :  { %s1081_s17 = smov 0   ;;  %s1083_s18 = smov 0  }
   0xb   :  { %s1085_s19 = smov 0  }
   0xc LB: > { %1443 = sst [smem:[#allocation11_spill]] %s1031_s17  ;;  %s578_s20 = sadd.s32 4294967295, %s1039_s19   ;;  %s1039_s19 = sphi %s1085_s19, %s19_s19   ;;  %s1035_s18 = sphi %s1083_s18, %s1478_s18   ;;  %s1031_s17 = sphi %s1081_s17, %s1477_s17   ;;  %s1027_s16 = sphi %s1079_s16, %s1476_s16   ;;  %s1023_s15 = sphi %s1077_s15, %s1467_s15   ;;  %s1019_s14 = sphi %s1075_s14, %s1475_s14   ;;  %s1015_s13 = sphi %s1073_s13, %s1474_s13   ;;  %s1011_s12 = sphi %s1071_s12, %s1473_s12   ;;  %s1007_s11 = sphi %s1069_s11, %s1472_s11   ;;  %s1003_s10 = sphi %s1067_s10, %s1471_s10   ;;  %s999_s9 = sphi %s1065_s9, %s1470_s9  }
   0xd   : > { %s579_s21 = sadd.s32 4294967294, %s1039_s19   ;;  %p54_p0 = scmp.ne.s32.totalorder %s1019_s14, %s1015_s13 }
   0xe   : > { %p55_p1 = scmp.eq.s32.totalorder %s1039_s19, 0  ;;  %p60_p2 = scmp.ne.s32.totalorder %s1015_s13, %s1011_s12 }
   0xf   : > { %p1125_p3 = scmp.eq.s32.totalorder %s578_s20, 0  ;;  %p111_p5 = scmp.ne.s32.totalorder %s1007_s11, %s1003_s10 }
  0x10   : > { %p1130_p4 = por %p55_p1, %p54_p0  ;;  %p112_p7 = scmp.eq.s32.totalorder %s578_s20, 24 }
  0x11   : > { %s1444_s23 = scalar_select %p1125_p3, 1, 0 }
  0x12   : > { %p1138_p6 = por %p1125_p3, %p60_p2  ;;  %p117_p8 = scmp.ne.s32.totalorder %s1003_s10, %s999_s9 }
  0x13   : > { %p118_p9 = scmp.eq.s32.totalorder %s579_s21, 24  ;;  %p1144_p10 = por %p112_p7, %p111_p5 }
  0x14   : > { %s1446_s26 = scalar_select %p1138_p6, 1, 0 }
  0x15   : > { %s1447_s27 = scalar_select %p1144_p10, 1, 0 }
  0x16   : > { %p580_p11 = scmp.ge.s32.totalorder %s1039_s19, 1  ;;  %p1149_p12 = por %p118_p9, %p117_p8 }
  0x17   : > { %p125_p13 = scmp.lt.s32.totalorder %s1039_s19, 26  ;;  %s1041_s30 = smov [#allocation5]  }
  0x18   : > { %s1448_s28 = scalar_select %p1149_p12, 1, 0 }
  0x19   : > { %p1154_p0 = pnand %p580_p11, %p125_p13  ;;  %s139_s3 = sshll.u32 %s1041_s30, 4  ;;  %s140_s3 = int_to_ptr.vmem [resolvable:$true] %s139_s3 }
  0x1a   : > { %1449 = sst [smem:[#allocation12_spill]] %s1448_s28  ;;  %p757_p2 = scmp.lt.s32.totalorder %s1039_s19, 25 }
  0x1b   : > { %s1450_s29 = scalar_select %p1154_p0, 1, 0 }
  0x1c   : > { %p744_p1 = pneg %p1154_p0  ;;  %p1169_p7 = pnand %p757_p2, %p1130_p4 }
  0x1d   : > { %s1453_s1 = sld [smem:[#allocation15_spill]] }
  0x1e   : > { %p1163_p5 = pnand %p744_p1, %p1125_p3 }
  0x1f   : > { %s1452_s5 = scalar_select %p1169_p7, 1, 0 }
  0x20   : > { %p857_p9 = pneg %p1163_p5 }
  0x23   : > { %s855_s8 = scalar_lea.hbm %s1453_s1, 10240 }
  0x24   : > { %p856_p8 = scmp.ne.s32.totalorder %s1453_s1, %s855_s8  ;;  %p862_p1 = scmp.lt.u32.totalorder %s855_s8, %s1453_s1 }
  0x26   : > { %p858_p11 = pnand %p857_p9, %p856_p8 }
  0x28   : > { %p859_p13 = pneg %p858_p11 }
  0x2a   : > { %p864_p4 = pnand %p862_p1, %p859_p13 }
  0x2c   : > { %867 = shalt.err (!%p864_p4)
}
  0x2d   : > { %s868_s25 = scalar_lea.vmem %s140_s3, 10240  ;;  %p876_p3 = scmp.lt.s32.totalorder %s140_s3, %s140_s3 }
  0x2e   : > { %p869_p2 = scmp.ne.s32.totalorder %s140_s3, %s868_s25  ;;  %p877_p6 = scmp.lt.s32.totalorder %s868_s25, %s868_s25 }
  0x30   : > { %p871_p12 = pnand %p869_p2, %p857_p9  ;;  %p878_p0 = por %p877_p6, %p876_p3 }
  0x32   : > { %p872_p10 = pneg %p871_p12 }
  0x34   : > { %p879_p7 = pnand %p878_p0, %p872_p10 }
  0x36   : > { %882 = shalt.err (!%p879_p7)
}
  0x37   : > { %s1436_s6 = smov 128   ;;  %s1437_s7 = smov 8  }
  0x38   : > { %747 = dma.hbm_to_vmem [thread:$0]  (!%p1163_p5), %s1453_s1, 10240, %s140_s3, [#allocation6], %s1436_s6, %s1436_s6, %s1437_s7  }
  0x39   : > { %s31_s20 = sadd.s32 1, %s1031_s17  ;;  %s38_s21 = sadd.s32 1, %s1035_s18 }
  0x3a   : > { %p32_p3 = scmp.ge.s32.totalorder %s31_s20, 5  ;;  %s153_s30 = sand.u32 1, %s1019_s14  }
  0x3b   : > { %s583_s25 = sshll.u32 %s153_s30, 7  ;;  %s735_s22 = smul.u32 80, %s1035_s18 }
  0x3c   : > { %s1480_s20 = smov (%p32_p3, %s31_s20), 0  ;;  %s1482_s21 = smov (!%p32_p3, %s38_s21), %s1035_s18 }
  0x3d   : > { %1454 = sst [smem:[#allocation13_spill]] %s1480_s20  ;;  %s43_s4 = ssub.s32 %s1031_s17, %s1480_s20 }
  0x3e   : > { %p40_p6 = scmp.ge.s32.totalorder %s1482_s21, 5  ;;  %s157_s24 = scalar_lea.vmem [#allocation2], %s583_s25 }
  0x3f   : > { %s166_s3 = sshll.u32 %s157_s24, 4  ;;  %s163_s8 = sadd.s32 %s1031_s17, %s735_s22  ;;  %s1204_s3 = int_to_ptr.vmem [resolvable:$true] %s166_s3 }
  0x40   : > { %s1484_s21 = smov (%p40_p6, %s1482_s21), 0  ;;  %s586_s6 = sshll.u32 %s163_s8, 7 }
  0x41   : > { %1455 = sst [smem:[#allocation14_spill]] %s1484_s21  ;;  %s42_s12 = ssub.s32 %s1035_s18, %s1484_s21 }
  0x42   : > { %s44_s7 = sor.u32 %s43_s4, %s42_s12  ;;  %p99_p10 = scmp.eq.s32.totalorder %s42_s12, 0 }
  0x43   : > { %p45_p12 = scmp.eq.s32.totalorder %s44_s7, 0  ;;  %s1211_s20 = scalar_lea.hbm %s1427_s0, %s586_s6 }
  0x44   : > { %s1456_s25 = sadd.s32 1, %s1007_s11  ;;  %s1457_s22 = sadd.s32 1, %s1019_s14 }
  0x45   : > { %s1216_s24 = scalar_select %p99_p10, %s1007_s11, %s1456_s25  }
  0x46   : > { %s1221_s17 = scalar_select %p45_p12, %s1019_s14, %s1457_s22  }
  0x47   : > { %s1223_s21 = scalar_lea.sflag [#allocation3], %s153_s30  ;;  %s883_s4 = scalar_lea.hbm %s1211_s20, 2048 }
  0x48   : > { %p884_p0 = scmp.ne.s32.totalorder %s1211_s20, %s883_s4  ;;  %p1458_p5 = scmp.ne.s32.totalorder %s1452_s5, 0 }
  0x49   : > { %s888_s6 = scalar_lea.hbm %s1427_s0, 51200  ;;  %p889_p11 = scmp.lt.u32.totalorder %s1211_s20, %s1427_s0 }
  0x4a   : > { %p885_p7 = pneg %p1458_p5  ;;  %p890_p13 = scmp.lt.u32.totalorder %s888_s6, %s883_s4 }
  0x4b   : > { %p892_p4 = scmp.lt.u32.totalorder %s883_s4, %s1211_s20 }
  0x4c   : > { %p886_p8 = pnand %p885_p7, %p884_p0  ;;  %p891_p1 = por %p890_p13, %p889_p11 }
  0x4e   : > { %p887_p9 = pneg %p886_p8  ;;  %p893_p2 = por %p892_p4, %p891_p1 }
  0x50   : > { %p894_p3 = pnand %p893_p2, %p887_p9 }
  0x52   : > { %897 = shalt.err (!%p894_p3)
}
  0x53   : > { %s898_s30 = scalar_lea.vmem %s1204_s3, 2048  ;;  %s1044_s12 = smov [#allocation2]  }
  0x54   : > { %p899_p6 = scmp.ne.s32.totalorder %s1204_s3, %s898_s30  ;;  %s903_s25 = sshll.u32 %s1044_s12, 4  ;;  %s904_s25 = int_to_ptr.vmem [resolvable:$false] %s903_s25 }
  0x55   : > { %s905_s22 = scalar_lea.vmem %s904_s25, 4096  ;;  %p906_p0 = scmp.lt.s32.totalorder %s1204_s3, %s904_s25 }
  0x56   : > { %p901_p10 = pnand %p899_p6, %p885_p7  ;;  %p907_p8 = scmp.lt.s32.totalorder %s905_s22, %s898_s30 }
  0x58   : > { %p902_p12 = pneg %p901_p10  ;;  %p908_p11 = por %p907_p8, %p906_p0 }
  0x5a   : > { %p909_p13 = pnand %p908_p11, %p902_p12 }
  0x5c   : > { %912 = shalt.err (!%p909_p13)
}
  0x5d   : > { %s1045_s4 = smov 640   ;;  %s1459_s1 = smov 8  }
  0x5e   : > { %s1460_s28 = smov 128   ;;  %p1461_p7 = scmp.ne.s32.totalorder %s1450_s29, 0 }
  0x5f   : > { %751 = dma.hbm_to_vmem [thread:$0]  (!%p1458_p5), %s1211_s20, 2048, %s1204_s3, %s1223_s21, %s1045_s4, %s1460_s28, %s1459_s1  }
  0x60   : > { %178 = sbr.rel (%p1461_p7) target bundleno = 397 (0x18d), region = 28  ;;  %s180_s6 = sand.u32 (!%p1461_p7), 1, %s1015_s13  }
  0x61   : > { %s588_s7 = sshll.u32 (!%p1461_p7), %s180_s6, 7  ;;  %s181_s8 = scalar_lea.sflag (!%p1461_p7), [#allocation3], %s180_s6 }
  0x62   : > { %s1256_s30 = scalar_lea.vmem (!%p1461_p7), [#allocation2], %s588_s7  ;;  %p1462_p9 = scmp.ne.s32.totalorder (!%p1461_p7), %s1446_s26, 0 }
  0x67   : > { %986 = dma.done.wait (%p1462_p9), %s181_s8, 2048  }
  0x68   : > { %988 = vsyncadd (%p1462_p9), %s181_s8, 4294965248  ;;  %p1463_p1 = scmp.ne.s32.totalorder %s1444_s23, 0 }
  0x6a   : > { %990 = dma.done.wait (%p1463_p1), [#allocation6], 10240  }
  0x6b   : > { %992 = vsyncadd (%p1463_p1), [#allocation6], 4294957056  ;;  %s206_s29 = sand.u32 1, %s1003_s10   ;;  %p591_p5 = scmp.ne.s32.totalorder %s1023_s15, 0 }
  0x6c   : > { %s590_s5 = sshll.u32 %s206_s29, 7  ;;  %v1046_v0 = vmov (!%p591_p5), 0.0  }
  0x6d   : > { %s1269_s20 = scalar_lea.vmem [#allocation7], %s590_s5  ;;  %214 = sbr.rel (%p591_p5) target bundleno = 118 (0x76), region = 40 }
  0x6e   : > { %215 = vst [vmem:[%s1269_s20] sm:$0xff] (!%p591_p5), %v1046_v0  ;;  %216 = vst [vmem:[%s1269_s20 + $0x8] sm:$0xff] (!%p591_p5), %v1046_v0 }
  0x6f   : > { %217 = vst [vmem:[%s1269_s20 + $0x10] sm:$0xff] (!%p591_p5), %v1046_v0  ;;  %218 = vst [vmem:[%s1269_s20 + $0x18] sm:$0xff] (!%p591_p5), %v1046_v0 }
  0x70   : > { %219 = vst [vmem:[%s1269_s20 + $0x20] sm:$0xff] (!%p591_p5), %v1046_v0  ;;  %220 = vst [vmem:[%s1269_s20 + $0x28] sm:$0xff] (!%p591_p5), %v1046_v0 }
  0x71   : > { %221 = vst [vmem:[%s1269_s20 + $0x30] sm:$0xff] (!%p591_p5), %v1046_v0  ;;  %222 = vst [vmem:[%s1269_s20 + $0x38] sm:$0xff] (!%p591_p5), %v1046_v0 }
  0x72   : > { %223 = vst [vmem:[%s1269_s20 + $0x40] sm:$0xff] (!%p591_p5), %v1046_v0  ;;  %224 = vst [vmem:[%s1269_s20 + $0x48] sm:$0xff] (!%p591_p5), %v1046_v0 }
  0x73   : > { %225 = vst [vmem:[%s1269_s20 + $0x50] sm:$0xff] (!%p591_p5), %v1046_v0  ;;  %226 = vst [vmem:[%s1269_s20 + $0x58] sm:$0xff] (!%p591_p5), %v1046_v0 }
  0x74   : > { %227 = vst [vmem:[%s1269_s20 + $0x60] sm:$0xff] %v1046_v0  ;;  %228 = vst [vmem:[%s1269_s20 + $0x68] sm:$0xff] %v1046_v0 }
  0x75   : > { %229 = vst [vmem:[%s1269_s20 + $0x70] sm:$0xff] %v1046_v0  ;;  %230 = vst [vmem:[%s1269_s20 + $0x78] sm:$0xff] %v1046_v0 }
  0x76 PF: > { %s592_s23 = sshll.u32 %s1023_s15, 7  ;;  %v265_v1 = vld [vmem:[%s1256_s30] sm:$0xff]  ;;  %v266_v27 = vld [vmem:[%s1256_s30 + $0x8] sm:$0xff]  ;;  %v267_v29 = vld [vmem:[%s1256_s30 + $0x10] sm:$0xff]  ;;  %s598_s15 = sshll.u32 %s1027_s16, 11 }
  0x77   : > { %v273_v2 = vld [vmem:[%s1256_s30 + $0x40] sm:$0xff]  ;;  %663 = vmatprep.mubr.f32.mxu0 %v265_v1  ;;  %s1291_s26 = scalar_lea.vmem [#allocation5], %s592_s23  ;;  %v274_v28 = vld [vmem:[%s1256_s30 + $0x48] sm:$0xff]  ;;  %v275_v30 = vld [vmem:[%s1256_s30 + $0x50] sm:$0xff]  ;;  %s473_s21 = sshll.u32 %s1269_s20, 4  ;;  %s1358_s21 = int_to_ptr.vmem [resolvable:$true] %s473_s21 }
  0x78   : > { %675 = vmatprep.mubr.f32.mxu1 %v273_v2  ;;  %v233_v3 = vld [vmem:[%s1291_s26] sm:$0xff]  ;;  %v234_v4 = vld [vmem:[%s1291_s26 + $0x8] sm:$0xff]  ;;  %v235_v5 = vld [vmem:[%s1291_s26 + $0x10] sm:$0xff]  ;;  %s1356_s12 = scalar_lea.hbm %s1429_s2, %s598_s15  ;;  %s1366_s25 = scalar_lea.sflag [#allocation4], %s206_s29 }
  0x79   : > { %v687_v6 = vpack.c.bf16 %v234_v4, %v233_v3  ;;  %v236_v7 = vld [vmem:[%s1291_s26 + $0x18] sm:$0xff]  ;;  %v237_v9 = vld [vmem:[%s1291_s26 + $0x20] sm:$0xff]  ;;  %v238_v10 = vld [vmem:[%s1291_s26 + $0x28] sm:$0xff]  ;;  %s913_s22 = scalar_lea.vmem %s1358_s21, 2048  ;;  %p1464_p2 = scmp.ne.s32.totalorder %s1447_s27, 0 }
  0x7a   : > { %v691_v8 = vpack.c.bf16 %v236_v7, %v235_v5  ;;  %v695_v11 = vpack.c.bf16 %v238_v10, %v237_v9  ;;  %v239_v12 = vld [vmem:[%s1291_s26 + $0x30] sm:$0xff]  ;;  %v240_v13 = vld [vmem:[%s1291_s26 + $0x38] sm:$0xff]  ;;  %v241_v15 = vld [vmem:[%s1291_s26 + $0x40] sm:$0xff]  ;;  %p914_p4 = scmp.ne.s32.totalorder %s1358_s21, %s913_s22  ;;  %s1047_s4 = smov [#allocation7]  }
  0x7b   : > { %688 = vmatprep.subr.bf16.mxu0 %v687_v6  ;;  %719 = vmatprep.subr.bf16.mxu1 %v687_v6  ;;  %v699_v14 = vpack.c.bf16 %v240_v13, %v239_v12  ;;  %v242_v16 = vld [vmem:[%s1291_s26 + $0x48] sm:$0xff]  ;;  %v243_v18 = vld [vmem:[%s1291_s26 + $0x50] sm:$0xff]  ;;  %v244_v19 = vld [vmem:[%s1291_s26 + $0x58] sm:$0xff]  ;;  %s917_s1 = sshll.u32 %s1047_s4, 4  ;;  %s918_s1 = int_to_ptr.vmem [resolvable:$false] %s917_s1 }
  0x7c   : > { %690 = vmatpush3.bf16.msra.mxu0 %v687_v6  ;;  %727 = vmatpush3.bf16.msra.mxu1 %v687_v6  ;;  %v703_v17 = vpack.c.bf16 %v242_v16, %v241_v15  ;;  %v707_v20 = vpack.c.bf16 %v244_v19, %v243_v18  ;;  %v245_v21 = vld [vmem:[%s1291_s26 + $0x60] sm:$0xff]  ;;  %v246_v22 = vld [vmem:[%s1291_s26 + $0x68] sm:$0xff]  ;;  %v247_v24 = vld [vmem:[%s1291_s26 + $0x70] sm:$0xff]  ;;  %p915_p3 = pnand %p914_p4, %p1464_p2  ;;  %s919_s28 = scalar_lea.vmem %s918_s1, 4096 }
  0x7d   : > { %692 = vmatprep.subr.bf16.mxu0 %v691_v8  ;;  %720 = vmatprep.subr.bf16.mxu1 %v691_v8  ;;  %v711_v23 = vpack.c.bf16 %v246_v22, %v245_v21  ;;  %v248_v25 = vld [vmem:[%s1291_s26 + $0x78] sm:$0xff]  ;;  %v269_v33 = vld [vmem:[%s1256_s30 + $0x20] sm:$0xff]  ;;  %v270_v35 = vld [vmem:[%s1256_s30 + $0x28] sm:$0xff]  ;;  %p920_p10 = scmp.lt.s32.totalorder %s1358_s21, %s918_s1  ;;  %p921_p12 = scmp.lt.s32.totalorder %s919_s28, %s913_s22 }
  0x7e   : > { %v715_v26 = vpack.c.bf16 %v248_v25, %v247_v24  ;;  %v268_v31 = vld [vmem:[%s1256_s30 + $0x18] sm:$0xff]  ;;  %v277_v34 = vld [vmem:[%s1256_s30 + $0x60] sm:$0xff]  ;;  %v278_v36 = vld [vmem:[%s1256_s30 + $0x68] sm:$0xff]  ;;  %p916_p6 = pneg %p915_p3 }
  0x7f   : > { %v276_v32 = vld [vmem:[%s1256_s30 + $0x58] sm:$0xff]  ;;  %v271_v37 = vld [vmem:[%s1256_s30 + $0x30] sm:$0xff]  ;;  %v250_v41 = vld [vmem:[%s1269_s20 + $0x8] sm:$0xff]  ;;  %p922_p0 = por %p921_p12, %p920_p10 }
  0x80   : > { %694 = vmatpush3.bf16.msra.mxu0 %v691_v8  ;;  %728 = vmatpush3.bf16.msra.mxu1 %v691_v8  ;;  %v279_v38 = vld [vmem:[%s1256_s30 + $0x70] sm:$0xff]  ;;  %v272_v39 = vld [vmem:[%s1256_s30 + $0x38] sm:$0xff]  ;;  %v258_v42 = vld [vmem:[%s1269_s20 + $0x48] sm:$0xff] }
  0x81   : > { %696 = vmatprep.subr.bf16.mxu0 %v695_v11  ;;  %721 = vmatprep.subr.bf16.mxu1 %v695_v11  ;;  %v280_v40 = vld [vmem:[%s1256_s30 + $0x78] sm:$0xff]  ;;  %v249_v43 = vld [vmem:[%s1269_s20] sm:$0xff]  ;;  %v251_v55 = vld [vmem:[%s1269_s20 + $0x10] sm:$0xff]  ;;  %p923_p8 = pnand %p922_p0, %p916_p6 }
  0x82   : > { %v257_v44 = vld [vmem:[%s1269_s20 + $0x40] sm:$0xff]  ;;  %v252_v53 = vld [vmem:[%s1269_s20 + $0x18] sm:$0xff]  ;;  %v259_v56 = vld [vmem:[%s1269_s20 + $0x50] sm:$0xff] }
  0x83   : > { %v260_v54 = vld [vmem:[%s1269_s20 + $0x58] sm:$0xff]  ;;  %v254_v1 = vld [vmem:[%s1269_s20 + $0x28] sm:$0xff]  ;;  %v253_v3 = vld [vmem:[%s1269_s20 + $0x20] sm:$0xff] }
  0x84   : > { %698 = vmatpush3.bf16.msra.mxu0 %v695_v11  ;;  %729 = vmatpush3.bf16.msra.mxu1 %v695_v11  ;;  %v262_v2 = vld [vmem:[%s1269_s20 + $0x68] sm:$0xff]  ;;  %v261_v4 = vld [vmem:[%s1269_s20 + $0x60] sm:$0xff]  ;;  %v256_v13 = vld [vmem:[%s1269_s20 + $0x38] sm:$0xff] }
  0x85   : > { %700 = vmatprep.subr.bf16.mxu0 %v699_v14  ;;  %722 = vmatprep.subr.bf16.mxu1 %v699_v14  ;;  %v255_v15 = vld [vmem:[%s1269_s20 + $0x30] sm:$0xff] }
  0x86   : > { %v263_v16 = vld [vmem:[%s1269_s20 + $0x70] sm:$0xff] }
  0x88   : > { %702 = vmatpush3.bf16.msra.mxu0 %v699_v14  ;;  %730 = vmatpush3.bf16.msra.mxu1 %v699_v14  ;;  %v264_v14 = vld [vmem:[%s1269_s20 + $0x78] sm:$0xff] }
  0x89   : > { %704 = vmatprep.subr.bf16.mxu0 %v703_v17  ;;  %723 = vmatprep.subr.bf16.mxu1 %v703_v17 }
  0x8c   : > { %706 = vmatpush3.bf16.msra.mxu0 %v703_v17  ;;  %731 = vmatpush3.bf16.msra.mxu1 %v703_v17 }
  0x8d   : > { %708 = vmatprep.subr.bf16.mxu0 %v707_v20  ;;  %724 = vmatprep.subr.bf16.mxu1 %v707_v20 }
  0x90   : > { %710 = vmatpush3.bf16.msra.mxu0 %v707_v20  ;;  %732 = vmatpush3.bf16.msra.mxu1 %v707_v20 }
  0x91   : > { %712 = vmatprep.subr.bf16.mxu0 %v711_v23  ;;  %725 = vmatprep.subr.bf16.mxu1 %v711_v23 }
  0x94   : > { %714 = vmatpush3.bf16.msra.mxu0 %v711_v23  ;;  %733 = vmatpush3.bf16.msra.mxu1 %v711_v23 }
  0x95   : > { %716 = vmatprep.subr.bf16.mxu0 %v715_v26  ;;  %726 = vmatprep.subr.bf16.mxu1 %v715_v26 }
  0x98   : > { %718 = vmatpush3.bf16.msra.mxu0 %v715_v26  ;;  %734 = vmatpush3.bf16.msra.mxu1 %v715_v26 }
  0x9b   : > { %664 = vmatmul.mubr.f32.vlgmr.msra.gmra.mrb[0].mxu0 %v266_v27  ;;  %676 = vmatmul.mubr.f32.vlgmr.msra.gmra.mrb[0].mxu1 %v274_v28 }
  0x9c   : > { %666 = vmatprep.mubr.f32.mxu0 %v267_v29  ;;  %678 = vmatprep.mubr.f32.mxu1 %v275_v30 }
  0x9f   : > { %667 = vmatmul.mubr.f32.gmra.mrb[2].mxu0 %v268_v31  ;;  %679 = vmatmul.mubr.f32.gmra.mrb[2].mxu1 %v276_v32 }
  0xa0   : > { %669 = vmatprep.mubr.f32.mxu0 %v269_v33  ;;  %681 = vmatprep.mubr.f32.mxu1 %v277_v34 }
  0xa3   : > { %670 = vmatmul.mubr.f32.gmra.mrb[4].mxu0 %v270_v35  ;;  %682 = vmatmul.mubr.f32.gmra.mrb[4].mxu1 %v278_v36 }
  0xa4   : > { %672 = vmatprep.mubr.f32.mxu0 %v271_v37  ;;  %684 = vmatprep.mubr.f32.mxu1 %v279_v38 }
  0xa7   : > { %673 = vmatmul.mubr.f32.gmra.mrb[6].mxu0 %v272_v39  ;;  %685 = vmatmul.mubr.f32.gmra.mrb[6].mxu1 %v280_v40 }
 0x16e   : > { %v665_v45 = vpop.f32.mrb[0].mxu0  ;;  %v677_v46 = vpop.f32.mrb[0].mxu1 }
 0x16f   : > { %v427_v47 = vadd.f32 %v665_v45, %v250_v41  ;;  %v435_v48 = vadd.f32 %v677_v46, %v258_v42  ;;  %v347_v49 = vpop.f32.mrb[1].mxu0  ;;  %v387_v50 = vpop.f32.mrb[1].mxu1 }
 0x170   : > { %v426_v51 = vadd.f32 %v347_v49, %v249_v43  ;;  %v434_v52 = vadd.f32 %v387_v50, %v257_v44 }
 0x171   : > { %443 = vst [vmem:[%s1269_s20 + $0x8] sm:$0xff] %v427_v47  ;;  %451 = vst [vmem:[%s1269_s20 + $0x48] sm:$0xff] %v435_v48 }
 0x172   : > { %442 = vst [vmem:[%s1269_s20] sm:$0xff] %v426_v51  ;;  %450 = vst [vmem:[%s1269_s20 + $0x40] sm:$0xff] %v434_v52  ;;  %v668_v57 = vpop.f32.mrb[2].mxu0  ;;  %v680_v58 = vpop.f32.mrb[2].mxu1 }
 0x173   : > { %v429_v59 = vadd.f32 %v668_v57, %v252_v53  ;;  %v437_v60 = vadd.f32 %v680_v58, %v260_v54  ;;  %v357_v61 = vpop.f32.mrb[3].mxu0  ;;  %v397_v62 = vpop.f32.mrb[3].mxu1 }
 0x174   : > { %v428_v63 = vadd.f32 %v357_v61, %v251_v55  ;;  %v436_v0 = vadd.f32 %v397_v62, %v259_v56 }
 0x175   : > { %445 = vst [vmem:[%s1269_s20 + $0x18] sm:$0xff] %v429_v59  ;;  %453 = vst [vmem:[%s1269_s20 + $0x58] sm:$0xff] %v437_v60 }
 0x176   : > { %444 = vst [vmem:[%s1269_s20 + $0x10] sm:$0xff] %v428_v63  ;;  %452 = vst [vmem:[%s1269_s20 + $0x50] sm:$0xff] %v436_v0  ;;  %v671_v5 = vpop.f32.mrb[4].mxu0  ;;  %v683_v6 = vpop.f32.mrb[4].mxu1 }
 0x177   : > { %v431_v7 = vadd.f32 %v671_v5, %v254_v1  ;;  %v439_v8 = vadd.f32 %v683_v6, %v262_v2  ;;  %v367_v9 = vpop.f32.mrb[5].mxu0  ;;  %v407_v10 = vpop.f32.mrb[5].mxu1 }
 0x178   : > { %v430_v11 = vadd.f32 %v367_v9, %v253_v3  ;;  %v438_v12 = vadd.f32 %v407_v10, %v261_v4 }
 0x179   : > { %447 = vst [vmem:[%s1269_s20 + $0x28] sm:$0xff] %v431_v7  ;;  %455 = vst [vmem:[%s1269_s20 + $0x68] sm:$0xff] %v439_v8 }
 0x17a   : > { %446 = vst [vmem:[%s1269_s20 + $0x20] sm:$0xff] %v430_v11  ;;  %454 = vst [vmem:[%s1269_s20 + $0x60] sm:$0xff] %v438_v12  ;;  %v674_v17 = vpop.f32.mrb[6].mxu0  ;;  %v686_v18 = vpop.f32.mrb[6].mxu1 }
 0x17b   : > { %v433_v19 = vadd.f32 %v674_v17, %v256_v13  ;;  %v441_v20 = vadd.f32 %v686_v18, %v264_v14  ;;  %v377_v21 = vpop.f32.mrb[7].mxu0  ;;  %v417_v22 = vpop.f32.mrb[7].mxu1 }
 0x17c   : > { %v432_v23 = vadd.f32 %v377_v21, %v255_v15  ;;  %v440_v24 = vadd.f32 %v417_v22, %v263_v16 }
 0x17d   : > { %449 = vst [vmem:[%s1269_s20 + $0x38] sm:$0xff] %v433_v19  ;;  %457 = vst [vmem:[%s1269_s20 + $0x78] sm:$0xff] %v441_v20 }
 0x17e   : > { %448 = vst [vmem:[%s1269_s20 + $0x30] sm:$0xff] %v432_v23  ;;  %456 = vst [vmem:[%s1269_s20 + $0x70] sm:$0xff] %v440_v24 }
 0x17f   : > { %926 = shalt.err (!%p923_p8)
}
 0x180   : > { %s927_s6 = scalar_lea.hbm %s1356_s12, 2048  ;;  %s931_s30 = scalar_lea.hbm %s1429_s2, 10240 }
 0x181   : > { %p928_p11 = scmp.ne.s32.totalorder %s1356_s12, %s927_s6  ;;  %p932_p9 = scmp.lt.u32.totalorder %s1356_s12, %s1429_s2 }
 0x182   : > { %p933_p1 = scmp.lt.u32.totalorder %s931_s30, %s927_s6  ;;  %p935_p4 = scmp.lt.u32.totalorder %s927_s6, %s1356_s12 }
 0x183   : > { %p929_p13 = pnand %p928_p11, %p1464_p2 }
 0x184   : > { %p934_p5 = por %p933_p1, %p932_p9 }
 0x185   : > { %p930_p7 = pneg %p929_p13 }
 0x186   : > { %p936_p3 = por %p935_p4, %p934_p5 }
 0x188   : > { %p937_p6 = pnand %p936_p3, %p930_p7 }
 0x18a   : > { %940 = shalt.err (!%p937_p6)
}
 0x18b   : > { %s1048_s20 = smov 128   ;;  %s1049_s23 = smov 8  }
 0x18c   : > { %742 = dma.vmem_to_hbm [thread:$0]  (%p1464_p2), %s1358_s21, 2048, %s1356_s12, %s1366_s25, %s1048_s20, %s1048_s20, %s1049_s23  }
 0x18d PF: > { %s1465_s26 = sld [smem:[#allocation12_spill]]  ;;  %p759_p10 = scmp.ge.s32.totalorder %s1039_s19, 2 }
 0x18e   : > { %s488_s15 = sand.u32 1, %s999_s9  }
 0x18f   : > { %s489_s16 = scalar_lea.sflag [#allocation4], %s488_s15 }
 0x193   : > { %p1466_p12 = scmp.ne.s32.totalorder %s1465_s26, 0 }
 0x195   : > { %p753_p0 = pnand %p759_p10, %p1466_p12 }
 0x197   : > { %994 = dma.done.wait (!%p753_p0), %s489_s16, 2048  }
 0x198   : > { %996 = vsyncadd (!%p753_p0), %s489_s16, 4294965248  ;;  %s19_s19 = sadd.s32 1, %s1039_s19   ;;  %s1467_s15 = sld [smem:[#allocation11_spill]] }
 0x199   : > { %p16_p8 = scmp.ge.s32.totalorder %s19_s19, 27   ;;  %s1468_s27 = sld [smem:[#allocation13_spill]] }
 0x19a   : > { %s1469_s21 = sld [smem:[#allocation14_spill]]  ;;  %s1470_s9 = smov %s1003_s10 }
 0x19b   : > { %s1471_s10 = smov %s1007_s11  ;;  %s1472_s11 = smov %s1216_s24 }
 0x19c   : > { %s1473_s12 = smov %s1015_s13  ;;  %s1474_s13 = smov %s1019_s14 }
 0x19d   : > { %s1475_s14 = smov %s1221_s17  ;;  %s1476_s16 = smov %s1035_s18 }
 0x19e   :  { %18 = sbr.rel (!%p16_p8) target bundleno = 12 (0xc), region = 83 }
 0x19f   : > { %s1477_s17 = smov %s1468_s27 }
 0x1a0   : > { %s1478_s18 = smov %s1469_s21 }
 0x1a5   :  { %494 = vsyncpa [#allocation3], 1 }
 0x1a6   :  { %496 = vsyncpa [#allocation3 + $0x1], 1 }
 0x1a7   :  { %497 = vsyncpa [#allocation6], 1 }
 0x1a8   :  { %498 = vsyncpa [#allocation4], 1 }
 0x1a9   :  { %500 = vsyncpa [#allocation4 + $0x1], 1 }

</bundles_post_ra>
